<compile_context>
chip_gen: v7x
topology: tpu7x:2x2x1
jax: 0.10.0
libtpu: 0.0.40
codegen_flags: <defaults>
</compile_context>

<pallas_src>
import jax
import jax.numpy as jnp
from jax.experimental import pallas as pl
from jax.experimental.pallas import tpu as pltpu

HIDDEN_SIZE = 50
INPUT_SIZE = 30 * 30 * 3      # 2700
NUM_CLASSES = 3

# Padded (lane-aligned) dimensions used inside the kernel.
K_PAD = 2816                  # 22 * 128  (2700 -> 2816)
H_PAD = 128                   # hidden 50 -> 128
C_PAD = 128                   # classes 3 -> 128

TM_MAX = 512                  # batch tile rows: 2 * (512,2816) bf16 tiles ~= 5.8 MB
                              # -> comfortably inside v7x's 64 MiB VMEM with weights resident.


def _round_up(n: int, m: int) -> int:
    return ((n + m - 1) // m) * m


def _pad_2d(a, rows, cols):
    r, c = a.shape
    return jnp.pad(a, ((0, rows - r), (0, cols - c)))


def _mlp_kernel(x_ref, w1_ref, b1_ref, w2_ref, b2_ref, out_ref):
    # x_ref: (TM, K_PAD) bf16, w1_ref: (K_PAD, H_PAD) bf16,
    # b1_ref: (1, H_PAD) f32, w2_ref: (H_PAD, C_PAD) f32, b2_ref: (1, C_PAD) f32.
    # fc1: bf16 MXU matmul with f32 accumulation.
    h = jnp.dot(x_ref[...], w1_ref[...], preferred_element_type=jnp.float32)
    h = jnp.maximum(h + b1_ref[...], 0.0)                       # bias + ReLU on VPU, f32
    # fc2: small 128x128 f32 matmul; padded lanes are exact zeros.
    o = jnp.dot(h, w2_ref[...], preferred_element_type=jnp.float32)
    out_ref[...] = o + b2_ref[...]                              # lane-dense (TM, 128) store


def neural_net_forward(x_nchw, w1, b1, w2, b2):
    """x_nchw: (B, 3, 30, 30) float32. Returns logits (B, NUM_CLASSES) float32."""
    batch = x_nchw.shape[0]
    # nn.Flatten: row-major flatten of (C, H, W) -> matches jnp.reshape.
    x_flat = x_nchw.reshape(batch, -1).astype(jnp.float32)      # (B, 2700)

    # Pick the batch tile. Small batches: single tile padded to a sublane
    # multiple (8). Large batches: fixed TM_MAX tiles, batch padded up.
    if batch >= TM_MAX:
        tm = TM_MAX
        b_pad = _round_up(batch, tm)
    else:
        b_pad = _round_up(batch, 8)
        tm = b_pad
    n_tiles = b_pad // tm

    # Zero-pad everything to lane/sublane-aligned shapes. bf16 for the
    # HBM-heavy operands (x, W1); bias / fc2 stay f32 (tiny, accumulator dtype).
    x_p = _pad_2d(x_flat, b_pad, K_PAD).astype(jnp.bfloat16)    # (b_pad, 2816) bf16
    w1_p = _pad_2d(w1, K_PAD, H_PAD).astype(jnp.bfloat16)       # (2816, 128)  bf16
    b1_p = _pad_2d(b1, 1, H_PAD).astype(jnp.float32)            # (1, 128)
    w2_p = _pad_2d(w2, H_PAD, C_PAD).astype(jnp.float32)        # (128, 128)
    b2_p = _pad_2d(b2, 1, C_PAD).astype(jnp.float32)            # (1, 128)

    out = pl.pallas_call(
        _mlp_kernel,
        out_shape=jax.ShapeDtypeStruct((b_pad, C_PAD), jnp.float32),
        grid=(n_tiles,),
        in_specs=[
            pl.BlockSpec((tm, K_PAD), lambda i: (i, 0)),        # x tile streams per step
            pl.BlockSpec((K_PAD, H_PAD), lambda i: (0, 0)),     # W1 VMEM-resident
            pl.BlockSpec((1, H_PAD), lambda i: (0, 0)),         # b1
            pl.BlockSpec((H_PAD, C_PAD), lambda i: (0, 0)),     # W2
            pl.BlockSpec((1, C_PAD), lambda i: (0, 0)),         # b2
        ],
        out_specs=pl.BlockSpec((tm, C_PAD), lambda i: (i, 0)),  # lane-dense output
        compiler_params=pltpu.CompilerParams(
            dimension_semantics=("parallel",),                  # megacore-shardable batch axis
            vmem_limit_bytes=64 << 20,
        ),
    )(x_p, w1_p, b1_p, w2_p, b2_p)

    # Strip batch padding and the padded logit lanes (they are exact zeros).
    return out[:batch, :NUM_CLASSES]


def init_params(key):
    """Deterministic init mimicking PyTorch Linear default U(-1/sqrt(fan_in), +)."""
    k1, k2, k3, k4 = jax.random.split(key, 4)
    lim1 = 1.0 / jnp.sqrt(jnp.float32(INPUT_SIZE))
    lim2 = 1.0 / jnp.sqrt(jnp.float32(HIDDEN_SIZE))
    # Stored as (in, out) so the kernel does x @ W (PyTorch stores (out, in)
    # and computes x @ W.T — same math).
    w1 = jax.random.uniform(k1, (INPUT_SIZE, HIDDEN_SIZE), jnp.float32, -lim1, lim1)
    b1 = jax.random.uniform(k2, (1, HIDDEN_SIZE), jnp.float32, -lim1, lim1)
    w2 = jax.random.uniform(k3, (HIDDEN_SIZE, NUM_CLASSES), jnp.float32, -lim2, lim2)
    b2 = jax.random.uniform(k4, (1, NUM_CLASSES), jnp.float32, -lim2, lim2)
    return w1, b1, w2, b2


if __name__ == "__main__":
    key = jax.random.PRNGKey(0)
    pkey, xkey = jax.random.split(key)
    w1, b1, w2, b2 = init_params(pkey)

    batch = 2
    x = jax.random.normal(xkey, (batch, 3, 30, 30), jnp.float32)  # NCHW

    logits = neural_net_forward(x, w1, b1, w2, b2)
    jax.block_until_ready(logits)
    assert logits.shape == (batch, NUM_CLASSES)

    # Reference with the same bf16 input/weight quantization (f32 accumulate),
    # so it verifies the kernel math exactly.
    x_flat = x.reshape(batch, -1)
    xb = x_flat.astype(jnp.bfloat16).astype(jnp.float32)
    w1b = w1.astype(jnp.bfloat16).astype(jnp.float32)
    ref = jnp.maximum(xb @ w1b + b1, 0.0) @ w2 + b2
    assert jnp.allclose(logits, ref, atol=2e-3, rtol=2e-3)

    # Looser sanity check against the full-f32 math (bf16 quantization error only).
    ref_f32 = jnp.maximum(x_flat @ w1 + b1, 0.0) @ w2 + b2
    assert jnp.allclose(logits, ref_f32, atol=5e-2, rtol=5e-2)

    print("KERNEL_OK")
</pallas_src>

<mosaic_0001>
module attributes {stable_mosaic.version = 11 : i64} {
  func.func @_mlp_kernel(%arg0: i32, %arg1: memref<8x2816xbf16, #tpu.memory_space<vmem>>, %arg2: memref<2816x128xbf16, #tpu.memory_space<vmem>>, %arg3: memref<1x128xf32, #tpu.memory_space<vmem>>, %arg4: memref<128x128xf32, #tpu.memory_space<vmem>>, %arg5: memref<1x128xf32, #tpu.memory_space<vmem>>, %arg6: memref<8x128xf32, #tpu.memory_space<vmem>>) attributes {dimension_semantics = [#tpu.dimension_semantics<parallel>], iteration_bounds = array<i64: 1>, scalar_prefetch = 0 : i64, scratch_operands = 0 : i64, tpu.core_type = #tpu.core_type<tc>, window_params = [{transform_indices = @transform_0, window_bounds = array<i64: 8, 2816>}, {pipeline_mode = #tpu.pipeline_mode<synchronous>, transform_indices = @transform_1, window_bounds = array<i64: 2816, 128>}, {pipeline_mode = #tpu.pipeline_mode<synchronous>, transform_indices = @transform_2, window_bounds = array<i64: 1, 128>}, {pipeline_mode = #tpu.pipeline_mode<synchronous>, transform_indices = @transform_3, window_bounds = array<i64: 128, 128>}, {pipeline_mode = #tpu.pipeline_mode<synchronous>, transform_indices = @transform_4, window_bounds = array<i64: 1, 128>}, {transform_indices = @transform_5, window_bounds = array<i64: 8, 128>}]} {
    %c0 = arith.constant 0 : index
    %c0_0 = arith.constant 0 : index
    %0 = vector.load %arg1[%c0, %c0_0] : memref<8x2816xbf16, #tpu.memory_space<vmem>>, vector<8x2816xbf16>
    %c0_1 = arith.constant 0 : index
    %c0_2 = arith.constant 0 : index
    %1 = vector.load %arg2[%c0_1, %c0_2] : memref<2816x128xbf16, #tpu.memory_space<vmem>>, vector<2816x128xbf16>
    %cst = arith.constant dense<0.000000e+00> : vector<8x128xf32>
    %2 = tpu.matmul %0, %1, %cst {dimension_numbers = #tpu.dot_dimension_numbers<[1], [0], [0], [1], [0, 0, 1, 1], [], []>} : vector<8x2816xbf16>, vector<2816x128xbf16>, vector<8x128xf32> -> vector<8x128xf32>
    %c0_3 = arith.constant 0 : index
    %c0_4 = arith.constant 0 : index
    %3 = vector.load %arg3[%c0_3, %c0_4] : memref<1x128xf32, #tpu.memory_space<vmem>>, vector<1x128xf32>
    %4 = vector.broadcast %3 : vector<1x128xf32> to vector<8x128xf32>
    %5 = arith.addf %2, %4 : vector<8x128xf32>
    %cst_5 = arith.constant 0.000000e+00 : f32
    %6 = vector.broadcast %cst_5 : f32 to vector<8x128xf32>
    %7 = arith.maximumf %5, %6 : vector<8x128xf32>
    %c0_6 = arith.constant 0 : index
    %c0_7 = arith.constant 0 : index
    %8 = vector.load %arg4[%c0_6, %c0_7] : memref<128x128xf32, #tpu.memory_space<vmem>>, vector<128x128xf32>
    %cst_8 = arith.constant dense<0.000000e+00> : vector<8x128xf32>
    %9 = tpu.matmul %7, %8, %cst_8 {dimension_numbers = #tpu.dot_dimension_numbers<[1], [0], [0], [1], [0, 0, 1, 1], [], []>} : vector<8x128xf32>, vector<128x128xf32>, vector<8x128xf32> -> vector<8x128xf32>
    %c0_9 = arith.constant 0 : index
    %c0_10 = arith.constant 0 : index
    %10 = vector.load %arg5[%c0_9, %c0_10] : memref<1x128xf32, #tpu.memory_space<vmem>>, vector<1x128xf32>
    %11 = vector.broadcast %10 : vector<1x128xf32> to vector<8x128xf32>
    %12 = arith.addf %9, %11 : vector<8x128xf32>
    %c0_11 = arith.constant 0 : index
    %c0_12 = arith.constant 0 : index
    %13 = vector.load %arg6[%c0_11, %c0_12] : memref<8x128xf32, #tpu.memory_space<vmem>>, vector<8x128xf32>
    tpu.vector_store %arg6[%c0_11, %c0_12], %12 {strides = array<i32>} : memref<8x128xf32, #tpu.memory_space<vmem>>, vector<8x128xf32>,
    return
  }
  func.func @transform_0(%arg0: i32) -> (i32, i32) {
    %c0_i32 = arith.constant 0 : i32
    %c0_i32_0 = arith.constant 0 : i32
    return %arg0, %c0_i32 : i32, i32
  }
  func.func @transform_1(%arg0: i32) -> (i32, i32) {
    %c0_i32 = arith.constant 0 : i32
    %c0_i32_0 = arith.constant 0 : i32
    %c0_i32_1 = arith.constant 0 : i32
    return %c0_i32, %c0_i32_0 : i32, i32
  }
  func.func @transform_2(%arg0: i32) -> (i32, i32) {
    %c0_i32 = arith.constant 0 : i32
    %c0_i32_0 = arith.constant 0 : i32
    %c0_i32_1 = arith.constant 0 : i32
    return %c0_i32, %c0_i32_0 : i32, i32
  }
  func.func @transform_3(%arg0: i32) -> (i32, i32) {
    %c0_i32 = arith.constant 0 : i32
    %c0_i32_0 = arith.constant 0 : i32
    %c0_i32_1 = arith.constant 0 : i32
    return %c0_i32, %c0_i32_0 : i32, i32
  }
  func.func @transform_4(%arg0: i32) -> (i32, i32) {
    %c0_i32 = arith.constant 0 : i32
    %c0_i32_0 = arith.constant 0 : i32
    %c0_i32_1 = arith.constant 0 : i32
    return %c0_i32, %c0_i32_0 : i32, i32
  }
  func.func @transform_5(%arg0: i32) -> (i32, i32) {
    %c0_i32 = arith.constant 0 : i32
    %c0_i32_0 = arith.constant 0 : i32
    return %arg0, %c0_i32 : i32, i32
  }
}

</mosaic_0001>

<bundles_post_ra>
// kernel: tpu_custom_call.1
= control target key start
LH: loop header
LB: loop body
LE: loop exit
PB: predicated region body
PF: predicated region fallthrough
CT: control target
= control target key end

     0   :  { %10 = vsyncpa [#allocation3], 0  ;;  %s3123_s0 = inlined_call_operand.hbm [shape: bf16[8,2816], index: 0, kind: input, shape index: {}]   ;;  %s3124_s1 = inlined_call_operand.hbm [shape: bf16[2816,128], index: 1, kind: input, shape index: {}]   ;;  %s3125_s2 = inlined_call_operand.hbm [shape: f32[1,128], index: 2, kind: input, shape index: {}]   ;;  %s3126_s3 = inlined_call_operand.hbm [shape: f32[128,128], index: 3, kind: input, shape index: {}]   ;;  %s3127_s4 = inlined_call_operand.hbm [shape: f32[1,128], index: 4, kind: input, shape index: {}]   ;;  %s3128_s5 = inlined_call_operand.hbm [shape: f32[8,128], index: 5, kind: output, shape index: {}]  }
   0x1   :  { %11 = vsyncpa [#allocation6], 0 }
   0x2   :  { %12 = vsyncpa [#allocation9], 0 }
   0x3   :  { %13 = vsyncpa [#allocation4], 0  ;;  %s3008_s18 = smov [#allocation5]   ;;  %s2868_s22 = scalar_lea.hbm %s3124_s1, 22528 }
   0x4   :  { %s29_s19 = sshll.u32 %s3008_s18, 4  ;;  %p2869_p0 = scmp.ne.s32.totalorder %s3124_s1, %s2868_s22  ;;  %s30_s19 = int_to_ptr.vmem [resolvable:$true] %s29_s19 }
   0x5   :  { %p2872_p1 = scmp.lt.u32.totalorder %s2868_s22, %s3124_s1 }
   0x7   :  { %p2874_p2 = pnand %p2872_p1, %p2869_p0 }
   0x9   :  { %2877 = shalt.err (!%p2874_p2)
}
   0xa   :  { %s2878_s27 = scalar_lea.vmem %s30_s19, 22528  ;;  %p2883_p4 = scmp.lt.s32.totalorder %s30_s19, %s30_s19 }
   0xb   :  { %p2879_p3 = scmp.ne.s32.totalorder %s30_s19, %s2878_s27  ;;  %p2884_p5 = scmp.lt.s32.totalorder %s2878_s27, %s2878_s27 }
   0xd   :  { %p2885_p6 = por %p2884_p5, %p2883_p4 }
   0xf   :  { %p2886_p7 = pnand %p2885_p6, %p2879_p3 }
  0x11   :  { %2889 = shalt.err (!%p2886_p7)
}
  0x12   :  { %s3009_s28 = smov 64   ;;  %s3010_s29 = smov 4  }
  0x13   :  { %35 = dma.hbm_to_vmem [thread:$0]  %s3124_s1, 22528, %s30_s19, [#allocation6], %s3009_s28, %s3009_s28, %s3010_s29  }
  0x14   :  { %s3011_s7 = smov [#allocation8]   ;;  %s2890_s11 = scalar_lea.hbm %s3126_s3, 2048 }
  0x15   :  { %s51_s8 = sshll.u32 %s3011_s7, 4  ;;  %p2891_p8 = scmp.ne.s32.totalorder %s3126_s3, %s2890_s11  ;;  %s52_s8 = int_to_ptr.vmem [resolvable:$true] %s51_s8 }
  0x16   :  { %p2894_p9 = scmp.lt.u32.totalorder %s2890_s11, %s3126_s3 }
  0x18   :  { %p2896_p10 = pnand %p2894_p9, %p2891_p8 }
  0x1a   :  { %2899 = shalt.err (!%p2896_p10)
}
  0x1b   :  { %s2900_s16 = scalar_lea.vmem %s52_s8, 2048  ;;  %p2905_p12 = scmp.lt.s32.totalorder %s52_s8, %s52_s8 }
  0x1c   :  { %p2901_p11 = scmp.ne.s32.totalorder %s52_s8, %s2900_s16  ;;  %p2906_p13 = scmp.lt.s32.totalorder %s2900_s16, %s2900_s16 }
  0x1e   :  { %p2907_p0 = por %p2906_p13, %p2905_p12 }
  0x20   :  { %p2908_p1 = pnand %p2907_p0, %p2901_p11 }
  0x22   :  { %2911 = shalt.err (!%p2908_p1)
}
  0x23   :  { %s3012_s1 = smov 128   ;;  %s3013_s17 = smov 8  }
  0x24   :  { %57 = dma.hbm_to_vmem [thread:$0]  %s3126_s3, 2048, %s52_s8, [#allocation9], %s3012_s1, %s3012_s1, %s3013_s17  }
  0x25   :  { %s3014_s20 = smov [#allocation2]   ;;  %s3015_s22 = smov [#allocation7]  }
  0x26   :  { %s20_s21 = sshll.u32 %s3014_s20, 4  ;;  %s42_s23 = sshll.u32 %s3015_s22, 4  ;;  %s21_s21 = int_to_ptr.vmem [resolvable:$true] %s20_s21  ;;  %s43_s23 = int_to_ptr.vmem [resolvable:$true] %s42_s23 }
  0x27   :  { %s2912_s26 = scalar_lea.hbm %s3123_s0, 1408 }
  0x28   :  { %p2913_p2 = scmp.ne.s32.totalorder %s3123_s0, %s2912_s26  ;;  %p2916_p3 = scmp.lt.u32.totalorder %s2912_s26, %s3123_s0 }
  0x2a   :  { %p2918_p4 = pnand %p2916_p3, %p2913_p2 }
  0x2c   :  { %2921 = shalt.err (!%p2918_p4)
}
  0x2d   :  { %s2922_s3 = scalar_lea.vmem %s21_s21, 1408  ;;  %p2927_p6 = scmp.lt.s32.totalorder %s21_s21, %s21_s21 }
  0x2e   :  { %p2923_p5 = scmp.ne.s32.totalorder %s21_s21, %s2922_s3  ;;  %p2928_p7 = scmp.lt.s32.totalorder %s2922_s3, %s2922_s3 }
  0x30   :  { %p2929_p8 = por %p2928_p7, %p2927_p6 }
  0x32   :  { %p2930_p9 = pnand %p2929_p8, %p2923_p5 }
  0x34   :  { %2933 = shalt.err (!%p2930_p9)
}
  0x35   :  { %23 = dma.hbm_to_vmem [thread:$0]  %s3123_s0, 1408, %s21_s21, [#allocation3]  }
  0x36   :  { %s2934_s10 = scalar_lea.hbm %s3125_s2, 16 }
  0x37   :  { %p2935_p10 = scmp.ne.s32.totalorder %s3125_s2, %s2934_s10  ;;  %p2938_p11 = scmp.lt.u32.totalorder %s2934_s10, %s3125_s2 }
  0x39   :  { %p2940_p12 = pnand %p2938_p11, %p2935_p10 }
  0x3b   :  { %2943 = shalt.err (!%p2940_p12)
}
  0x3c   :  { %s2944_s15 = scalar_lea.vmem %s43_s23, 16  ;;  %s2948_s16 = scalar_lea.vmem %s43_s23, 32 }
  0x3d   :  { %p2945_p13 = scmp.ne.s32.totalorder %s43_s23, %s2944_s15  ;;  %p2949_p0 = scmp.lt.s32.totalorder %s43_s23, %s43_s23 }
  0x3e   :  { %p2950_p1 = scmp.lt.s32.totalorder %s2948_s16, %s2944_s15 }
  0x40   :  { %p2951_p2 = por %p2950_p1, %p2949_p0 }
  0x42   :  { %p2952_p3 = pnand %p2951_p2, %p2945_p13 }
  0x44   :  { %2955 = shalt.err (!%p2952_p3)
}
  0x45   :  { %45 = dma.hbm_to_vmem [thread:$0]  %s3125_s2, 16, %s43_s23, [#allocation6]  }
  0x46   :  { %s3016_s17 = smov [#allocation10]   ;;  %s2956_s21 = scalar_lea.hbm %s3127_s4, 16 }
  0x47   :  { %s64_s18 = sshll.u32 %s3016_s17, 4  ;;  %p2957_p4 = scmp.ne.s32.totalorder %s3127_s4, %s2956_s21  ;;  %s65_s18 = int_to_ptr.vmem [resolvable:$true] %s64_s18 }
  0x48   :  { %p2960_p5 = scmp.lt.u32.totalorder %s2956_s21, %s3127_s4 }
  0x4a   :  { %p2962_p6 = pnand %p2960_p5, %p2957_p4 }
  0x4c   :  { %2965 = shalt.err (!%p2962_p6)
}
  0x4d   :  { %s2966_s27 = scalar_lea.vmem %s65_s18, 16  ;;  %s2970_s2 = scalar_lea.vmem %s65_s18, 32 }
  0x4e   :  { %p2967_p7 = scmp.ne.s32.totalorder %s65_s18, %s2966_s27  ;;  %p2971_p8 = scmp.lt.s32.totalorder %s65_s18, %s65_s18 }
  0x4f   :  { %p2972_p9 = scmp.lt.s32.totalorder %s2970_s2, %s2966_s27 }
  0x51   :  { %p2973_p10 = por %p2972_p9, %p2971_p8 }
  0x53   :  { %p2974_p11 = pnand %p2973_p10, %p2967_p7 }
  0x55   :  { %2977 = shalt.err (!%p2974_p11)
}
  0x56   :  { %67 = dma.hbm_to_vmem [thread:$0]  %s3127_s4, 16, %s65_s18, [#allocation9]  }
  0x57   :  { %3000 = dma.done.wait [#allocation3], 1408  }
  0x58   :  { %3001 = vsyncadd [#allocation3], 4294965888 }
  0x59   :  { %3002 = dma.done.wait [#allocation6], 22544  }
  0x5a   :  { %3003 = vsyncadd [#allocation6], 4294944752 }
  0x5b   :  { %3004 = dma.done.wait [#allocation9], 2064  }
  0x5c   :  { %3005 = vsyncadd [#allocation9], 4294965232  ;;  %v2670_v0 = vld [vmem:[#allocation5 + $0x40] sm:$0xff]   ;;  %v2674_v4 = vld [vmem:[#allocation5 + $0x48] sm:$0xff]   ;;  %vm3018_vm0 = vmmov 0   ;;  %s3020_s4 = smov [#allocation11]  }
  0x5d   :  { %v2671_v1 = vld [vmem:[#allocation5] sm:$0xff]   ;;  %2339 = vmatprep.subr.bf16.mxu0 %v2670_v0  ;;  %v2675_v5 = vld [vmem:[#allocation5 + $0x8] sm:$0xff]   ;;  %v2678_v8 = vld [vmem:[#allocation5 + $0x50] sm:$0xff]   ;;  %s2128_s29 = sshll.u32 %s3020_s4, 4  ;;  %s2129_s29 = int_to_ptr.vmem [resolvable:$true] %s2128_s29 }
  0x5e   :  { %v2672_v2 = vld [vmem:[#allocation5 + $0xc0] sm:$0xff]   ;;  %2340 = vmatpush3.bf16.msra.mxu0 %v2671_v1  ;;  %v2676_v6 = vld [vmem:[#allocation5 + $0xc8] sm:$0xff]   ;;  %v2679_v9 = vld [vmem:[#allocation5 + $0x10] sm:$0xff]   ;;  %s2978_s30 = scalar_lea.vmem %s2129_s29, 128  ;;  %p2983_p13 = scmp.lt.s32.totalorder %s2129_s29, %s2129_s29 }
  0x5f   :  { %v2673_v3 = vld [vmem:[#allocation5 + $0x80] sm:$0xff]   ;;  %2361 = vmatprep.subr.bf16.mxu1 %v2672_v2  ;;  %2341 = vmatprep.subr.bf16.mxu0 %v2674_v4  ;;  %v2677_v7 = vld [vmem:[#allocation5 + $0x88] sm:$0xff]   ;;  %v2680_v10 = vld [vmem:[#allocation5 + $0xd0] sm:$0xff]   ;;  %p2979_p12 = scmp.ne.s32.totalorder %s2129_s29, %s2978_s30  ;;  %p2984_p0 = scmp.lt.s32.totalorder %s2978_s30, %s2978_s30 }
  0x60   :  { %2362 = vmatpush3.bf16.msra.mxu1 %v2673_v3  ;;  %v2681_v11 = vld [vmem:[#allocation5 + $0x90] sm:$0xff]   ;;  %v2682_v12 = vld [vmem:[#allocation5 + $0x58] sm:$0xff]   ;;  %v2686_v16 = vld [vmem:[#allocation5 + $0x60] sm:$0xff]  }
  0x61   :  { %2363 = vmatprep.subr.bf16.mxu1 %v2676_v6  ;;  %v2683_v13 = vld [vmem:[#allocation5 + $0x18] sm:$0xff]   ;;  %v2687_v17 = vld [vmem:[#allocation5 + $0x20] sm:$0xff]   ;;  %v2690_v20 = vld [vmem:[#allocation5 + $0x68] sm:$0xff]   ;;  %p2985_p1 = por %p2984_p0, %p2983_p13 }
  0x62   :  { %2342 = vmatpush3.bf16.msra.mxu0 %v2675_v5  ;;  %v2684_v14 = vld [vmem:[#allocation5 + $0xd8] sm:$0xff]   ;;  %v2688_v18 = vld [vmem:[#allocation5 + $0xe0] sm:$0xff]   ;;  %v2691_v21 = vld [vmem:[#allocation5 + $0x28] sm:$0xff]  }
  0x63   :  { %2343 = vmatprep.subr.bf16.mxu0 %v2678_v8  ;;  %v2685_v15 = vld [vmem:[#allocation5 + $0x98] sm:$0xff]   ;;  %v2689_v19 = vld [vmem:[#allocation5 + $0xa0] sm:$0xff]   ;;  %v2692_v22 = vld [vmem:[#allocation5 + $0xe8] sm:$0xff]   ;;  %p2986_p2 = pnand %p2985_p1, %p2979_p12 }
  0x64   :  { %2364 = vmatpush3.bf16.msra.mxu1 %v2677_v7  ;;  %v2693_v23 = vld [vmem:[#allocation5 + $0xa8] sm:$0xff]   ;;  %v2694_v24 = vld [vmem:[#allocation5 + $0x70] sm:$0xff]   ;;  %v2698_v28 = vld [vmem:[#allocation5 + $0x78] sm:$0xff]  }
  0x65   :  { %2365 = vmatprep.subr.bf16.mxu1 %v2680_v10  ;;  %v2695_v25 = vld [vmem:[#allocation5 + $0x30] sm:$0xff]   ;;  %v2699_v29 = vld [vmem:[#allocation5 + $0x38] sm:$0xff]   ;;  %v84_v31 = vld [vmem:[#allocation2] sm:$0xff] }
  0x66   :  { %2344 = vmatpush3.bf16.msra.mxu0 %v2679_v9  ;;  %v2696_v26 = vld [vmem:[#allocation5 + $0xf0] sm:$0xff]   ;;  %v2700_v30 = vld [vmem:[#allocation5 + $0xf8] sm:$0xff]   ;;  %v2140_v32 = vcombine.low %v84_v31, %v84_v31  ;;  %v2141_v33 = vcombine.high %v84_v31, %v84_v31  ;;  %v2704_v35 = vld [vmem:[#allocation5 + $0x140] sm:$0xff]  }
  0x67   :  { %2345 = vmatprep.subr.bf16.mxu0 %v2682_v12  ;;  %v2697_v27 = vld [vmem:[#allocation5 + $0xb0] sm:$0xff]   ;;  %v2703_v34 = vld [vmem:[#allocation5 + $0xb8] sm:$0xff]   ;;  %v2707_v39 = vld [vmem:[#allocation5 + $0x100] sm:$0xff]  }
  0x68   :  { %2366 = vmatpush3.bf16.msra.mxu1 %v2681_v11  ;;  %v85_v36 = vld [vmem:[#allocation2 + $0x8] sm:$0xff]  ;;  %1619 = vmatprep.mubr.bf16.mxu0 %v2141_v33  ;;  %v2708_v40 = vld [vmem:[#allocation5 + $0x1c0] sm:$0xff]   ;;  %v2710_v42 = vld [vmem:[#allocation5 + $0x148] sm:$0xff]  }
  0x69   :  { %2367 = vmatprep.subr.bf16.mxu1 %v2684_v14  ;;  %v2142_v37 = vcombine.low %v85_v36, %v85_v36  ;;  %v2143_v38 = vcombine.high %v85_v36, %v85_v36  ;;  %v2709_v41 = vld [vmem:[#allocation5 + $0x180] sm:$0xff]   ;;  %v2711_v43 = vld [vmem:[#allocation5 + $0x108] sm:$0xff]   ;;  %v2714_v46 = vld [vmem:[#allocation5 + $0x150] sm:$0xff]  }
  0x6a   :  { %2346 = vmatpush3.bf16.msra.mxu0 %v2683_v13  ;;  %v2712_v44 = vld [vmem:[#allocation5 + $0x1c8] sm:$0xff]   ;;  %v2715_v47 = vld [vmem:[#allocation5 + $0x110] sm:$0xff]   ;;  %v2718_v50 = vld [vmem:[#allocation5 + $0x158] sm:$0xff]  }
  0x6b   :  { %2347 = vmatprep.subr.bf16.mxu0 %v2686_v16  ;;  %1659 = vmatprep.mubr.bf16.mxu1 %v2143_v38  ;;  %v2713_v45 = vld [vmem:[#allocation5 + $0x188] sm:$0xff]   ;;  %v2716_v48 = vld [vmem:[#allocation5 + $0x1d0] sm:$0xff]   ;;  %v2719_v51 = vld [vmem:[#allocation5 + $0x118] sm:$0xff]  }
  0x6c   :  { %2368 = vmatpush3.bf16.msra.mxu1 %v2685_v15  ;;  %v2717_v49 = vld [vmem:[#allocation5 + $0x190] sm:$0xff]   ;;  %v2720_v52 = vld [vmem:[#allocation5 + $0x1d8] sm:$0xff]   ;;  %v2722_v54 = vld [vmem:[#allocation5 + $0x160] sm:$0xff]  }
  0x6d   :  { %2369 = vmatprep.subr.bf16.mxu1 %v2688_v18  ;;  %v2721_v53 = vld [vmem:[#allocation5 + $0x198] sm:$0xff]   ;;  %v2723_v55 = vld [vmem:[#allocation5 + $0x120] sm:$0xff]   ;;  %v2726_v58 = vld [vmem:[#allocation5 + $0x168] sm:$0xff]  }
  0x6e   :  { %2348 = vmatpush3.bf16.msra.mxu0 %v2687_v17  ;;  %v2724_v56 = vld [vmem:[#allocation5 + $0x1e0] sm:$0xff]   ;;  %v2727_v59 = vld [vmem:[#allocation5 + $0x128] sm:$0xff]   ;;  %v2730_v62 = vld [vmem:[#allocation5 + $0x170] sm:$0xff]  }
  0x6f   :  { %2349 = vmatprep.subr.bf16.mxu0 %v2690_v20  ;;  %v2725_v57 = vld [vmem:[#allocation5 + $0x1a0] sm:$0xff]   ;;  %v2728_v60 = vld [vmem:[#allocation5 + $0x1e8] sm:$0xff]   ;;  %v2731_v63 = vld [vmem:[#allocation5 + $0x130] sm:$0xff]  }
  0x70   :  { %2370 = vmatpush3.bf16.msra.mxu1 %v2689_v19  ;;  %v2729_v61 = vld [vmem:[#allocation5 + $0x1a8] sm:$0xff]   ;;  %v2732_v0 = vld [vmem:[#allocation5 + $0x1f0] sm:$0xff]   ;;  %v2734_v2 = vld [vmem:[#allocation5 + $0x178] sm:$0xff]  }
  0x71   :  { %2371 = vmatprep.subr.bf16.mxu1 %v2692_v22  ;;  %v2733_v1 = vld [vmem:[#allocation5 + $0x1b0] sm:$0xff]   ;;  %v2735_v3 = vld [vmem:[#allocation5 + $0x138] sm:$0xff]   ;;  %v2740_v9 = vld [vmem:[#allocation5 + $0x240] sm:$0xff]  }
  0x72   :  { %2350 = vmatpush3.bf16.msra.mxu0 %v2691_v21  ;;  %v2736_v4 = vld [vmem:[#allocation5 + $0x1f8] sm:$0xff]   ;;  %v87_v10 = vld [vmem:[#allocation2 + $0x18] sm:$0xff]  ;;  %v2746_v16 = vld [vmem:[#allocation5 + $0x248] sm:$0xff]  }
  0x73   :  { %2351 = vmatprep.subr.bf16.mxu0 %v2694_v24  ;;  %v86_v5 = vld [vmem:[#allocation2 + $0x10] sm:$0xff]  ;;  %v2146_v11 = vcombine.low %v87_v10, %v87_v10  ;;  %v2147_v12 = vcombine.high %v87_v10, %v87_v10  ;;  %v2743_v13 = vld [vmem:[#allocation5 + $0x200] sm:$0xff]   ;;  %v2747_v17 = vld [vmem:[#allocation5 + $0x208] sm:$0xff]  }
  0x74   :  { %2372 = vmatpush3.bf16.msra.mxu1 %v2693_v23  ;;  %v2144_v6 = vcombine.low %v86_v5, %v86_v5  ;;  %v2145_v7 = vcombine.high %v86_v5, %v86_v5  ;;  %v2739_v8 = vld [vmem:[#allocation5 + $0x1b8] sm:$0xff]   ;;  %v2744_v14 = vld [vmem:[#allocation5 + $0x2c0] sm:$0xff]   ;;  %v2748_v18 = vld [vmem:[#allocation5 + $0x2c8] sm:$0xff]  }
  0x75   :  { %2373 = vmatprep.subr.bf16.mxu1 %v2696_v26  ;;  %v2745_v15 = vld [vmem:[#allocation5 + $0x280] sm:$0xff]   ;;  %v2749_v19 = vld [vmem:[#allocation5 + $0x288] sm:$0xff]   ;;  %v2750_v20 = vld [vmem:[#allocation5 + $0x250] sm:$0xff]  }
  0x76   :  { %2352 = vmatpush3.bf16.msra.mxu0 %v2695_v25  ;;  %v2751_v21 = vld [vmem:[#allocation5 + $0x210] sm:$0xff]   ;;  %v2754_v24 = vld [vmem:[#allocation5 + $0x258] sm:$0xff]   ;;  %v2761_v31 = vld [vmem:[#allocation5 + $0x2a0] sm:$0xff]  }
  0x77   :  { %2353 = vmatprep.subr.bf16.mxu0 %v2698_v28  ;;  %v2752_v22 = vld [vmem:[#allocation5 + $0x2d0] sm:$0xff]   ;;  %v2755_v25 = vld [vmem:[#allocation5 + $0x218] sm:$0xff]   ;;  %v2758_v28 = vld [vmem:[#allocation5 + $0x260] sm:$0xff]  }
  0x78   :  { %2374 = vmatpush3.bf16.msra.mxu1 %v2697_v27  ;;  %v2753_v23 = vld [vmem:[#allocation5 + $0x290] sm:$0xff]   ;;  %v2756_v26 = vld [vmem:[#allocation5 + $0x2d8] sm:$0xff]   ;;  %v2763_v33 = vld [vmem:[#allocation5 + $0x228] sm:$0xff]  }
  0x79   :  { %2375 = vmatprep.subr.bf16.mxu1 %v2700_v30  ;;  %v2757_v27 = vld [vmem:[#allocation5 + $0x298] sm:$0xff]   ;;  %v2760_v30 = vld [vmem:[#allocation5 + $0x2e0] sm:$0xff]   ;;  %v2766_v36 = vld [vmem:[#allocation5 + $0x270] sm:$0xff]  }
  0x7a   :  { %2354 = vmatpush3.bf16.msra.mxu0 %v2699_v29  ;;  %v2759_v29 = vld [vmem:[#allocation5 + $0x220] sm:$0xff]   ;;  %v2768_v38 = vld [vmem:[#allocation5 + $0x2f0] sm:$0xff]  }
  0x7b   :  { %2383 = vmatprep.subr.bf16.mxu0 %v2704_v35  ;;  %v2765_v35 = vld [vmem:[#allocation5 + $0x2a8] sm:$0xff]   ;;  %v2797_v5 = vld [vmem:[#allocation5 + $0x3a0] sm:$0xff]   ;;  %v2802_v10 = vld [vmem:[#allocation5 + $0x370] sm:$0xff]  }
  0x7c   :  { %2376 = vmatpush3.bf16.msra.mxu1 %v2703_v34  ;;  %v2764_v34 = vld [vmem:[#allocation5 + $0x2e8] sm:$0xff]  }
  0x7d   :  { %1620 = vmatmul.mubr.bf16.vlgmr.msra.gmra.mrb[0].mxu0 %v2140_v32  ;;  %2405 = vmatprep.subr.bf16.mxu1 %v2708_v40  ;;  %v2762_v32 = vld [vmem:[#allocation5 + $0x268] sm:$0xff]   ;;  %v2770_v40 = vld [vmem:[#allocation5 + $0x278] sm:$0xff]  }
  0x7e   :  { %2384 = vmatpush3.bf16.msra.mxu0 %v2707_v39  ;;  %1699 = vmatprep.mubr.bf16.mxu0 %v2145_v7  ;;  %v2769_v39 = vld [vmem:[#allocation5 + $0x2b0] sm:$0xff]   ;;  %v2799_v7 = vld [vmem:[#allocation5 + $0x328] sm:$0xff]  }
  0x7f   :  { %1660 = vmatmul.mubr.bf16.vlgmr.msra.gmra.mrb[0].mxu1 %v2142_v37  ;;  %2385 = vmatprep.subr.bf16.mxu0 %v2710_v42  ;;  %v2767_v37 = vld [vmem:[#allocation5 + $0x230] sm:$0xff]   ;;  %v2772_v42 = vld [vmem:[#allocation5 + $0x2f8] sm:$0xff]  }
  0x80   :  { %2406 = vmatpush3.bf16.msra.mxu1 %v2709_v41  ;;  %1739 = vmatprep.mubr.bf16.mxu1 %v2147_v12  ;;  %v2771_v41 = vld [vmem:[#allocation5 + $0x238] sm:$0xff]   ;;  %v2804_v12 = vld [vmem:[#allocation5 + $0x3f0] sm:$0xff]  }
  0x81   :  { %2407 = vmatprep.subr.bf16.mxu1 %v2712_v44 }
  0x82   :  { %2386 = vmatpush3.bf16.msra.mxu0 %v2711_v43  ;;  %v88_v43 = vld [vmem:[#allocation2 + $0x20] sm:$0xff] }
  0x83   :  { %2387 = vmatprep.subr.bf16.mxu0 %v2714_v46  ;;  %v2148_v44 = vcombine.low %v88_v43, %v88_v43  ;;  %v2775_v46 = vld [vmem:[#allocation5 + $0x2b8] sm:$0xff]  }
  0x84   :  { %2408 = vmatpush3.bf16.msra.mxu1 %v2713_v45  ;;  %v2149_v45 = vcombine.high %v88_v43, %v88_v43  ;;  %v2833_v43 = vld [vmem:[#allocation5 + $0x4a0] sm:$0xff]  }
  0x85   :  { %2409 = vmatprep.subr.bf16.mxu1 %v2716_v48  ;;  %v89_v48 = vld [vmem:[#allocation2 + $0x28] sm:$0xff] }
  0x86   :  { %2388 = vmatpush3.bf16.msra.mxu0 %v2715_v47  ;;  %v2776_v47 = vld [vmem:[#allocation5 + $0x340] sm:$0xff]  }
  0x87   :  { %2389 = vmatprep.subr.bf16.mxu0 %v2718_v50  ;;  %v2151_v50 = vcombine.high %v89_v48, %v89_v48 }
  0x88   :  { %2410 = vmatpush3.bf16.msra.mxu1 %v2717_v49  ;;  %v2150_v49 = vcombine.low %v89_v48, %v89_v48  ;;  %v2838_v48 = vld [vmem:[#allocation5 + $0x470] sm:$0xff]  }
  0x89   :  { %2411 = vmatprep.subr.bf16.mxu1 %v2720_v52  ;;  %v2780_v52 = vld [vmem:[#allocation5 + $0x3c0] sm:$0xff]  }
  0x8a   :  { %2390 = vmatpush3.bf16.msra.mxu0 %v2719_v51  ;;  %v2779_v51 = vld [vmem:[#allocation5 + $0x300] sm:$0xff]  }
  0x8b   :  { %2391 = vmatprep.subr.bf16.mxu0 %v2722_v54  ;;  %v2782_v54 = vld [vmem:[#allocation5 + $0x348] sm:$0xff]  }
  0x8c   :  { %2412 = vmatpush3.bf16.msra.mxu1 %v2721_v53  ;;  %v2781_v53 = vld [vmem:[#allocation5 + $0x380] sm:$0xff]  }
  0x8d   :  { %2413 = vmatprep.subr.bf16.mxu1 %v2724_v56  ;;  %v2784_v56 = vld [vmem:[#allocation5 + $0x3c8] sm:$0xff]  }
  0x8e   :  { %2392 = vmatpush3.bf16.msra.mxu0 %v2723_v55  ;;  %v2783_v55 = vld [vmem:[#allocation5 + $0x308] sm:$0xff]  }
  0x8f   :  { %2393 = vmatprep.subr.bf16.mxu0 %v2726_v58  ;;  %v2786_v58 = vld [vmem:[#allocation5 + $0x350] sm:$0xff]  }
  0x90   :  { %2414 = vmatpush3.bf16.msra.mxu1 %v2725_v57  ;;  %v2785_v57 = vld [vmem:[#allocation5 + $0x388] sm:$0xff]  }
  0x91   :  { %2415 = vmatprep.subr.bf16.mxu1 %v2728_v60  ;;  %v2788_v60 = vld [vmem:[#allocation5 + $0x3d0] sm:$0xff]  }
  0x92   :  { %2394 = vmatpush3.bf16.msra.mxu0 %v2727_v59  ;;  %v2787_v59 = vld [vmem:[#allocation5 + $0x310] sm:$0xff]  }
  0x93   :  { %2395 = vmatprep.subr.bf16.mxu0 %v2730_v62  ;;  %v2790_v62 = vld [vmem:[#allocation5 + $0x358] sm:$0xff]  }
  0x94   :  { %2416 = vmatpush3.bf16.msra.mxu1 %v2729_v61  ;;  %v2789_v61 = vld [vmem:[#allocation5 + $0x390] sm:$0xff]  }
  0x95   :  { %2417 = vmatprep.subr.bf16.mxu1 %v2732_v0  ;;  %v2792_v0 = vld [vmem:[#allocation5 + $0x3d8] sm:$0xff]  }
  0x96   :  { %2396 = vmatpush3.bf16.msra.mxu0 %v2731_v63  ;;  %v2791_v63 = vld [vmem:[#allocation5 + $0x318] sm:$0xff]  }
  0x97   :  { %2397 = vmatprep.subr.bf16.mxu0 %v2734_v2  ;;  %v2794_v2 = vld [vmem:[#allocation5 + $0x360] sm:$0xff]  }
  0x98   :  { %2418 = vmatpush3.bf16.msra.mxu1 %v2733_v1  ;;  %v2793_v1 = vld [vmem:[#allocation5 + $0x398] sm:$0xff]  }
  0x99   :  { %2419 = vmatprep.subr.bf16.mxu1 %v2736_v4  ;;  %v2796_v4 = vld [vmem:[#allocation5 + $0x3e0] sm:$0xff]  }
  0x9a   :  { %2398 = vmatpush3.bf16.msra.mxu0 %v2735_v3  ;;  %v2795_v3 = vld [vmem:[#allocation5 + $0x320] sm:$0xff]  }
  0x9b   :  { %2427 = vmatprep.subr.bf16.mxu0 %v2740_v9  ;;  %v2801_v9 = vld [vmem:[#allocation5 + $0x3a8] sm:$0xff]  }
  0x9c   :  { %2420 = vmatpush3.bf16.msra.mxu1 %v2739_v8  ;;  %v2800_v8 = vld [vmem:[#allocation5 + $0x3e8] sm:$0xff]  }
  0x9d   :  { %1700 = vmatmul.mubr.bf16.vlgmr.msra.gmra.mrb[4].mxu0 %v2144_v6  ;;  %2449 = vmatprep.subr.bf16.mxu1 %v2744_v14  ;;  %v2798_v6 = vld [vmem:[#allocation5 + $0x368] sm:$0xff]   ;;  %v2806_v14 = vld [vmem:[#allocation5 + $0x378] sm:$0xff]  }
  0x9e   :  { %2428 = vmatpush3.bf16.msra.mxu0 %v2743_v13  ;;  %1779 = vmatprep.mubr.bf16.mxu0 %v2149_v45  ;;  %v2805_v13 = vld [vmem:[#allocation5 + $0x3b0] sm:$0xff]   ;;  %v2835_v45 = vld [vmem:[#allocation5 + $0x428] sm:$0xff]  }
  0x9f   :  { %1740 = vmatmul.mubr.bf16.vlgmr.msra.gmra.mrb[4].mxu1 %v2146_v11  ;;  %2429 = vmatprep.subr.bf16.mxu0 %v2746_v16  ;;  %v2803_v11 = vld [vmem:[#allocation5 + $0x330] sm:$0xff]   ;;  %v2808_v16 = vld [vmem:[#allocation5 + $0x3f8] sm:$0xff]  }
  0xa0   :  { %2450 = vmatpush3.bf16.msra.mxu1 %v2745_v15  ;;  %1819 = vmatprep.mubr.bf16.mxu1 %v2151_v50  ;;  %v2807_v15 = vld [vmem:[#allocation5 + $0x338] sm:$0xff]   ;;  %v2840_v50 = vld [vmem:[#allocation5 + $0x4f0] sm:$0xff]  }
  0xa1   :  { %2451 = vmatprep.subr.bf16.mxu1 %v2748_v18 }
  0xa2   :  { %2430 = vmatpush3.bf16.msra.mxu0 %v2747_v17  ;;  %v90_v17 = vld [vmem:[#allocation2 + $0x30] sm:$0xff] }
  0xa3   :  { %2431 = vmatprep.subr.bf16.mxu0 %v2750_v20  ;;  %v2152_v18 = vcombine.low %v90_v17, %v90_v17  ;;  %v2811_v20 = vld [vmem:[#allocation5 + $0x3b8] sm:$0xff]  }
  0xa4   :  { %2452 = vmatpush3.bf16.msra.mxu1 %v2749_v19  ;;  %v2153_v19 = vcombine.high %v90_v17, %v90_v17 }
  0xa5   :  { %2453 = vmatprep.subr.bf16.mxu1 %v2752_v22  ;;  %v91_v22 = vld [vmem:[#allocation2 + $0x38] sm:$0xff] }
  0xa6   :  { %2432 = vmatpush3.bf16.msra.mxu0 %v2751_v21  ;;  %v2812_v21 = vld [vmem:[#allocation5 + $0x440] sm:$0xff]  }
  0xa7   :  { %2433 = vmatprep.subr.bf16.mxu0 %v2754_v24  ;;  %v2155_v24 = vcombine.high %v91_v22, %v91_v22 }
  0xa8   :  { %2454 = vmatpush3.bf16.msra.mxu1 %v2753_v23  ;;  %v2154_v23 = vcombine.low %v91_v22, %v91_v22 }
  0xa9   :  { %2455 = vmatprep.subr.bf16.mxu1 %v2756_v26  ;;  %v2816_v26 = vld [vmem:[#allocation5 + $0x4c0] sm:$0xff]  }
  0xaa   :  { %2434 = vmatpush3.bf16.msra.mxu0 %v2755_v25  ;;  %v2815_v25 = vld [vmem:[#allocation5 + $0x400] sm:$0xff]  }
  0xab   :  { %2435 = vmatprep.subr.bf16.mxu0 %v2758_v28  ;;  %v2818_v28 = vld [vmem:[#allocation5 + $0x448] sm:$0xff]  }
  0xac   :  { %2456 = vmatpush3.bf16.msra.mxu1 %v2757_v27  ;;  %v2817_v27 = vld [vmem:[#allocation5 + $0x480] sm:$0xff]  }
  0xad   :  { %2457 = vmatprep.subr.bf16.mxu1 %v2760_v30  ;;  %v2820_v30 = vld [vmem:[#allocation5 + $0x4c8] sm:$0xff]  }
  0xae   :  { %2436 = vmatpush3.bf16.msra.mxu0 %v2759_v29  ;;  %v2819_v29 = vld [vmem:[#allocation5 + $0x408] sm:$0xff]  }
  0xaf   :  { %2437 = vmatprep.subr.bf16.mxu0 %v2762_v32  ;;  %v2822_v32 = vld [vmem:[#allocation5 + $0x450] sm:$0xff]  }
  0xb0   :  { %2458 = vmatpush3.bf16.msra.mxu1 %v2761_v31  ;;  %v2821_v31 = vld [vmem:[#allocation5 + $0x488] sm:$0xff]  }
  0xb1   :  { %2459 = vmatprep.subr.bf16.mxu1 %v2764_v34  ;;  %v2824_v34 = vld [vmem:[#allocation5 + $0x4d0] sm:$0xff]  }
  0xb2   :  { %2438 = vmatpush3.bf16.msra.mxu0 %v2763_v33  ;;  %v2823_v33 = vld [vmem:[#allocation5 + $0x410] sm:$0xff]  }
  0xb3   :  { %2439 = vmatprep.subr.bf16.mxu0 %v2766_v36  ;;  %v2826_v36 = vld [vmem:[#allocation5 + $0x458] sm:$0xff]  }
  0xb4   :  { %2460 = vmatpush3.bf16.msra.mxu1 %v2765_v35  ;;  %v2825_v35 = vld [vmem:[#allocation5 + $0x490] sm:$0xff]  }
  0xb5   :  { %2461 = vmatprep.subr.bf16.mxu1 %v2768_v38  ;;  %v2828_v38 = vld [vmem:[#allocation5 + $0x4d8] sm:$0xff]  }
  0xb6   :  { %2440 = vmatpush3.bf16.msra.mxu0 %v2767_v37  ;;  %v2827_v37 = vld [vmem:[#allocation5 + $0x418] sm:$0xff]  }
  0xb7   :  { %2441 = vmatprep.subr.bf16.mxu0 %v2770_v40  ;;  %v2830_v40 = vld [vmem:[#allocation5 + $0x460] sm:$0xff]  }
  0xb8   :  { %2462 = vmatpush3.bf16.msra.mxu1 %v2769_v39  ;;  %v2829_v39 = vld [vmem:[#allocation5 + $0x498] sm:$0xff]  }
  0xb9   :  { %2463 = vmatprep.subr.bf16.mxu1 %v2772_v42  ;;  %v2832_v42 = vld [vmem:[#allocation5 + $0x4e0] sm:$0xff]  }
  0xba   :  { %2442 = vmatpush3.bf16.msra.mxu0 %v2771_v41  ;;  %v2831_v41 = vld [vmem:[#allocation5 + $0x420] sm:$0xff]  }
  0xbb   :  { %2471 = vmatprep.subr.bf16.mxu0 %v2776_v47  ;;  %v2837_v47 = vld [vmem:[#allocation5 + $0x4a8] sm:$0xff]  }
  0xbc   :  { %2464 = vmatpush3.bf16.msra.mxu1 %v2775_v46  ;;  %v2836_v46 = vld [vmem:[#allocation5 + $0x4e8] sm:$0xff]  }
  0xbd   :  { %1780 = vmatmul.mubr.bf16.vlgmr.msra.gmra.mrb[8].mxu0 %v2148_v44  ;;  %2493 = vmatprep.subr.bf16.mxu1 %v2780_v52  ;;  %v2834_v44 = vld [vmem:[#allocation5 + $0x468] sm:$0xff]   ;;  %v2842_v52 = vld [vmem:[#allocation5 + $0x478] sm:$0xff]  }
  0xbe   :  { %2472 = vmatpush3.bf16.msra.mxu0 %v2779_v51  ;;  %1859 = vmatprep.mubr.bf16.mxu0 %v2153_v19  ;;  %v2841_v51 = vld [vmem:[#allocation5 + $0x4b0] sm:$0xff]  }
  0xbf   :  { %1820 = vmatmul.mubr.bf16.vlgmr.msra.gmra.mrb[8].mxu1 %v2150_v49  ;;  %2473 = vmatprep.subr.bf16.mxu0 %v2782_v54  ;;  %v2839_v49 = vld [vmem:[#allocation5 + $0x430] sm:$0xff]   ;;  %v2844_v54 = vld [vmem:[#allocation5 + $0x4f8] sm:$0xff]  }
  0xc0   :  { %2494 = vmatpush3.bf16.msra.mxu1 %v2781_v53  ;;  %1899 = vmatprep.mubr.bf16.mxu1 %v2155_v24  ;;  %v2843_v53 = vld [vmem:[#allocation5 + $0x438] sm:$0xff]  }
  0xc1   :  { %2495 = vmatprep.subr.bf16.mxu1 %v2784_v56 }
  0xc2   :  { %2474 = vmatpush3.bf16.msra.mxu0 %v2783_v55  ;;  %v92_v55 = vld [vmem:[#allocation2 + $0x40] sm:$0xff] }
  0xc3   :  { %2475 = vmatprep.subr.bf16.mxu0 %v2786_v58  ;;  %v2156_v56 = vcombine.low %v92_v55, %v92_v55  ;;  %v2847_v58 = vld [vmem:[#allocation5 + $0x4b8] sm:$0xff]  }
  0xc4   :  { %2496 = vmatpush3.bf16.msra.mxu1 %v2785_v57  ;;  %v2157_v57 = vcombine.high %v92_v55, %v92_v55 }
  0xc5   :  { %2497 = vmatprep.subr.bf16.mxu1 %v2788_v60  ;;  %v93_v60 = vld [vmem:[#allocation2 + $0x48] sm:$0xff] }
  0xc6   :  { %2476 = vmatpush3.bf16.msra.mxu0 %v2787_v59  ;;  %v2848_v59 = vld [vmem:[#allocation5 + $0x540] sm:$0xff]  }
  0xc7   :  { %2477 = vmatprep.subr.bf16.mxu0 %v2790_v62  ;;  %v2159_v62 = vcombine.high %v93_v60, %v93_v60 }
  0xc8   :  { %2498 = vmatpush3.bf16.msra.mxu1 %v2789_v61  ;;  %v2158_v61 = vcombine.low %v93_v60, %v93_v60 }
  0xc9   :  { %2499 = vmatprep.subr.bf16.mxu1 %v2792_v0  ;;  %v2852_v0 = vld [vmem:[#allocation5 + $0x548] sm:$0xff]  }
  0xca   :  { %2478 = vmatpush3.bf16.msra.mxu0 %v2791_v63  ;;  %v2851_v63 = vld [vmem:[#allocation5 + $0x500] sm:$0xff]  }
  0xcb   :  { %2479 = vmatprep.subr.bf16.mxu0 %v2794_v2  ;;  %v2854_v2 = vld [vmem:[#allocation5 + $0x550] sm:$0xff]  }
  0xcc   :  { %2500 = vmatpush3.bf16.msra.mxu1 %v2793_v1  ;;  %v2853_v1 = vld [vmem:[#allocation5 + $0x508] sm:$0xff]  }
  0xcd   :  { %2501 = vmatprep.subr.bf16.mxu1 %v2796_v4  ;;  %v2856_v4 = vld [vmem:[#allocation5 + $0x558] sm:$0xff]  }
  0xce   :  { %2480 = vmatpush3.bf16.msra.mxu0 %v2795_v3  ;;  %v2855_v3 = vld [vmem:[#allocation5 + $0x510] sm:$0xff]  }
  0xcf   :  { %2481 = vmatprep.subr.bf16.mxu0 %v2798_v6  ;;  %v2858_v6 = vld [vmem:[#allocation5 + $0x560] sm:$0xff]  }
  0xd0   :  { %2502 = vmatpush3.bf16.msra.mxu1 %v2797_v5  ;;  %v2857_v5 = vld [vmem:[#allocation5 + $0x518] sm:$0xff]  }
  0xd1   :  { %2503 = vmatprep.subr.bf16.mxu1 %v2800_v8  ;;  %v94_v8 = vld [vmem:[#allocation2 + $0x50] sm:$0xff] }
  0xd2   :  { %2482 = vmatpush3.bf16.msra.mxu0 %v2799_v7  ;;  %v2859_v7 = vld [vmem:[#allocation5 + $0x520] sm:$0xff]  }
  0xd3   :  { %2483 = vmatprep.subr.bf16.mxu0 %v2802_v10  ;;  %v2161_v10 = vcombine.high %v94_v8, %v94_v8 }
  0xd4   :  { %2504 = vmatpush3.bf16.msra.mxu1 %v2801_v9  ;;  %v2860_v9 = vld [vmem:[#allocation5 + $0x568] sm:$0xff]  }
  0xd5   :  { %2505 = vmatprep.subr.bf16.mxu1 %v2804_v12  ;;  %v2862_v12 = vld [vmem:[#allocation5 + $0x570] sm:$0xff]  }
  0xd6   :  { %2484 = vmatpush3.bf16.msra.mxu0 %v2803_v11  ;;  %v2861_v11 = vld [vmem:[#allocation5 + $0x528] sm:$0xff]  }
  0xd7   :  { %2485 = vmatprep.subr.bf16.mxu0 %v2806_v14  ;;  %v2864_v14 = vld [vmem:[#allocation5 + $0x578] sm:$0xff]  }
  0xd8   :  { %2506 = vmatpush3.bf16.msra.mxu1 %v2805_v13  ;;  %v2863_v13 = vld [vmem:[#allocation5 + $0x530] sm:$0xff]  }
  0xd9   :  { %2507 = vmatprep.subr.bf16.mxu1 %v2808_v16  ;;  %v2160_v16 = vcombine.low %v94_v8, %v94_v8 }
  0xda   :  { %2486 = vmatpush3.bf16.msra.mxu0 %v2807_v15  ;;  %v2865_v15 = vld [vmem:[#allocation5 + $0x538] sm:$0xff]  }
  0xdb   :  { %2515 = vmatprep.subr.bf16.mxu0 %v2812_v21 }
  0xdc   :  { %2508 = vmatpush3.bf16.msra.mxu1 %v2811_v20 }
  0xdd   :  { %1860 = vmatmul.mubr.bf16.vlgmr.msra.gmra.mrb[12].mxu0 %v2152_v18  ;;  %2537 = vmatprep.subr.bf16.mxu1 %v2816_v26  ;;  %v2139_v18 = vld [vmem:[#allocation7] ss:$0 sm:$0xff] }
  0xde   :  { %2516 = vmatpush3.bf16.msra.mxu0 %v2815_v25  ;;  %1939 = vmatprep.mubr.bf16.mxu0 %v2157_v57 }
  0xdf   :  { %1900 = vmatmul.mubr.bf16.vlgmr.msra.gmra.mrb[12].mxu1 %v2154_v23  ;;  %2517 = vmatprep.subr.bf16.mxu0 %v2818_v28 }
  0xe0   :  { %2538 = vmatpush3.bf16.msra.mxu1 %v2817_v27  ;;  %1979 = vmatprep.mubr.bf16.mxu1 %v2159_v62  ;;  %v2042_v62 = vld [vmem:[#allocation8 + $0x70] sm:$0xff] }
  0xe1   :  { %2539 = vmatprep.subr.bf16.mxu1 %v2820_v30  ;;  %v2028_v30 = vld [vmem:[#allocation8] sm:$0xff] }
  0xe2   :  { %2518 = vmatpush3.bf16.msra.mxu0 %v2819_v29 }
  0xe3   :  { %2519 = vmatprep.subr.bf16.mxu0 %v2822_v32  ;;  %v2030_v32 = vld [vmem:[#allocation8 + $0x10] sm:$0xff] }
  0xe4   :  { %2540 = vmatpush3.bf16.msra.mxu1 %v2821_v31  ;;  %v2029_v31 = vld [vmem:[#allocation8 + $0x8] sm:$0xff] }
  0xe5   :  { %2541 = vmatprep.subr.bf16.mxu1 %v2824_v34  ;;  %v2634_v34 = vpack.c.bf16 %v2029_v31, %v2028_v30 }
  0xe6   :  { %2520 = vmatpush3.bf16.msra.mxu0 %v2823_v33  ;;  %v3017_v33 = vmov 0.0|0.0  }
  0xe7   :  { %2521 = vmatprep.subr.bf16.mxu0 %v2826_v36 }
  0xe8   :  { %2542 = vmatpush3.bf16.msra.mxu1 %v2825_v35  ;;  %v2031_v35 = vld [vmem:[#allocation8 + $0x18] sm:$0xff] }
  0xe9   :  { %2543 = vmatprep.subr.bf16.mxu1 %v2828_v38  ;;  %v2637_v36 = vpack.c.bf16 %v2031_v35, %v2030_v32  ;;  %v2033_v38 = vld [vmem:[#allocation8 + $0x28] sm:$0xff] }
  0xea   :  { %2522 = vmatpush3.bf16.msra.mxu0 %v2827_v37  ;;  %v2032_v37 = vld [vmem:[#allocation8 + $0x20] sm:$0xff] }
  0xeb   :  { %2523 = vmatprep.subr.bf16.mxu0 %v2830_v40  ;;  %v2034_v40 = vld [vmem:[#allocation8 + $0x30] sm:$0xff] }
  0xec   :  { %2544 = vmatpush3.bf16.msra.mxu1 %v2829_v39  ;;  %v2640_v39 = vpack.c.bf16 %v2033_v38, %v2032_v37 }
  0xed   :  { %2545 = vmatprep.subr.bf16.mxu1 %v2832_v42 }
  0xee   :  { %2524 = vmatpush3.bf16.msra.mxu0 %v2831_v41  ;;  %v2035_v41 = vld [vmem:[#allocation8 + $0x38] sm:$0xff] }
  0xef   :  { %2525 = vmatprep.subr.bf16.mxu0 %v2834_v44  ;;  %v2643_v42 = vpack.c.bf16 %v2035_v41, %v2034_v40  ;;  %v2037_v44 = vld [vmem:[#allocation8 + $0x48] sm:$0xff] }
  0xf0   :  { %2546 = vmatpush3.bf16.msra.mxu1 %v2833_v43  ;;  %v2036_v43 = vld [vmem:[#allocation8 + $0x40] sm:$0xff] }
  0xf1   :  { %2547 = vmatprep.subr.bf16.mxu1 %v2836_v46  ;;  %v2038_v46 = vld [vmem:[#allocation8 + $0x50] sm:$0xff] }
  0xf2   :  { %2526 = vmatpush3.bf16.msra.mxu0 %v2835_v45  ;;  %v2646_v45 = vpack.c.bf16 %v2037_v44, %v2036_v43 }
  0xf3   :  { %2527 = vmatprep.subr.bf16.mxu0 %v2838_v48 }
  0xf4   :  { %2548 = vmatpush3.bf16.msra.mxu1 %v2837_v47  ;;  %v2039_v47 = vld [vmem:[#allocation8 + $0x58] sm:$0xff] }
  0xf5   :  { %2549 = vmatprep.subr.bf16.mxu1 %v2840_v50  ;;  %v2649_v48 = vpack.c.bf16 %v2039_v47, %v2038_v46  ;;  %v2338_v47 = vld [vmem:[#allocation10] ss:$0 sm:$0xff] }
  0xf6   :  { %2528 = vmatpush3.bf16.msra.mxu0 %v2839_v49 }
  0xf7   :  { %2529 = vmatprep.subr.bf16.mxu0 %v2842_v52  ;;  %v2041_v52 = vld [vmem:[#allocation8 + $0x68] sm:$0xff] }
  0xf8   :  { %2550 = vmatpush3.bf16.msra.mxu1 %v2841_v51  ;;  %v2040_v51 = vld [vmem:[#allocation8 + $0x60] sm:$0xff] }
  0xf9   :  { %2551 = vmatprep.subr.bf16.mxu1 %v2844_v54  ;;  %v2652_v55 = vpack.c.bf16 %v2041_v52, %v2040_v51 }
  0xfa   :  { %2530 = vmatpush3.bf16.msra.mxu0 %v2843_v53 }
  0xfb   :  { %2559 = vmatprep.subr.bf16.mxu0 %v2848_v59 }
  0xfc   :  { %2552 = vmatpush3.bf16.msra.mxu1 %v2847_v58 }
  0xfd   :  { %1940 = vmatmul.mubr.bf16.vlgmr.msra.gmra.mrb[16].mxu0 %v2156_v56  ;;  %2633 = vmatprep.subr.bf16.mxu1 %v3017_v33 }
  0xfe   :  { %2560 = vmatpush3.bf16.msra.mxu0 %v2851_v63  ;;  %2019 = vmatprep.mubr.bf16.mxu0 %v2161_v10  ;;  %v2043_v63 = vld [vmem:[#allocation8 + $0x78] sm:$0xff] }
  0xff   :  { %1980 = vmatmul.mubr.bf16.vlgmr.msra.gmra.mrb[16].mxu1 %v2158_v61  ;;  %2561 = vmatprep.subr.bf16.mxu0 %v2852_v0 }
 0x100   :  { %2635 = vmatpush3.bf16.msra.mxu1 %v2634_v34 }
 0x101   :  { %2636 = vmatprep.subr.bf16.mxu1 %v3017_v33 }
 0x102   :  { %2562 = vmatpush3.bf16.msra.mxu0 %v2853_v1  ;;  %v2655_v1 = vpack.c.bf16 %v2043_v63, %v2042_v62 }
 0x103   :  { %2563 = vmatprep.subr.bf16.mxu0 %v2854_v2 }
 0x104   :  { %2638 = vmatpush3.bf16.msra.mxu1 %v2637_v36 }
 0x105   :  { %2639 = vmatprep.subr.bf16.mxu1 %v3017_v33 }
 0x106   :  { %2564 = vmatpush3.bf16.msra.mxu0 %v2855_v3  ;;  %v3019_v3 = vmov 0.0  }
 0x107   :  { %2565 = vmatprep.subr.bf16.mxu0 %v2856_v4  ;;  %2630 = vmatprep.mubr.msk.f32.mxu1 %vm3018_vm0, %v3019_v3 }
 0x108   :  { %2641 = vmatpush3.bf16.msra.mxu1 %v2640_v39 }
 0x109   :  { %2642 = vmatprep.subr.bf16.mxu1 %v3017_v33 }
 0x10a   :  { %2566 = vmatpush3.bf16.msra.mxu0 %v2857_v5 }
 0x10b   :  { %2567 = vmatprep.subr.bf16.mxu0 %v2858_v6 }
 0x10c   :  { %2644 = vmatpush3.bf16.msra.mxu1 %v2643_v42 }
 0x10d   :  { %2645 = vmatprep.subr.bf16.mxu1 %v3017_v33 }
 0x10e   :  { %2568 = vmatpush3.bf16.msra.mxu0 %v2859_v7 }
 0x10f   :  { %2569 = vmatprep.subr.bf16.mxu0 %v2860_v9 }
 0x110   :  { %2647 = vmatpush3.bf16.msra.mxu1 %v2646_v45 }
 0x111   :  { %2648 = vmatprep.subr.bf16.mxu1 %v3017_v33 }
 0x112   :  { %2570 = vmatpush3.bf16.msra.mxu0 %v2861_v11 }
 0x113   :  { %2571 = vmatprep.subr.bf16.mxu0 %v2862_v12 }
 0x114   :  { %2650 = vmatpush3.bf16.msra.mxu1 %v2649_v48 }
 0x115   :  { %2651 = vmatprep.subr.bf16.mxu1 %v3017_v33 }
 0x116   :  { %2572 = vmatpush3.bf16.msra.mxu0 %v2863_v13 }
 0x117   :  { %2573 = vmatprep.subr.bf16.mxu0 %v2864_v14 }
 0x118   :  { %2653 = vmatpush3.bf16.msra.mxu1 %v2652_v55 }
 0x119   :  { %2654 = vmatprep.subr.bf16.mxu1 %v3017_v33 }
 0x11a   :  { %2574 = vmatpush3.bf16.msra.mxu0 %v2865_v15 }
 0x11c   :  { %2656 = vmatpush3.bf16.msra.mxu1 %v2655_v1 }
 0x11d   :  { %2020 = vmatmul.mubr.bf16.vlgmr.msra.gmra.mrb[20].mxu0 %v2160_v16 }
 0x150   :  { %v2355_v17 = vpop.f32.mrb[0].mxu0 }
 0x151   :  { %v2356_v19 = vpop.f32.mrb[1].mxu0 }
 0x152   :  { %v2357_v20 = vadd.f32 %v2356_v19, %v2355_v17  ;;  %v2358_v21 = vpop.f32.mrb[2].mxu0  ;;  %v2377_v22 = vpop.f32.mrb[0].mxu1 }
 0x153   :  { %v2359_v23 = vpop.f32.mrb[3].mxu0  ;;  %v2378_v24 = vpop.f32.mrb[1].mxu1 }
 0x154   :  { %v1622_v25 = vadd.f32 %v2357_v20, %v2139_v18  ;;  %v2379_v26 = vadd.f32 %v2378_v24, %v2377_v22  ;;  %v2380_v27 = vpop.f32.mrb[2].mxu1 }
 0x155   :  { %v2381_v28 = vpop.f32.mrb[3].mxu1 }
 0x156   :  { %v1662_v29 = vadd.f32 %v2379_v26, %v1622_v25 }
 0x170   :  { %v2399_v49 = vpop.f32.mrb[4].mxu0 }
 0x171   :  { %v2400_v50 = vpop.f32.mrb[5].mxu0 }
 0x172   :  { %v2401_v53 = vadd.f32 %v2400_v50, %v2399_v49  ;;  %v2402_v54 = vpop.f32.mrb[6].mxu0  ;;  %v2421_v56 = vpop.f32.mrb[4].mxu1 }
 0x173   :  { %v2403_v57 = vpop.f32.mrb[7].mxu0  ;;  %v2422_v59 = vpop.f32.mrb[5].mxu1 }
 0x174   :  { %v1702_v58 = vadd.f32 %v2401_v53, %v1662_v29  ;;  %v2423_v60 = vadd.f32 %v2422_v59, %v2421_v56  ;;  %v2424_v61 = vpop.f32.mrb[6].mxu1 }
 0x175   :  { %v2425_v0 = vpop.f32.mrb[7].mxu1 }
 0x176   :  { %v1742_v2 = vadd.f32 %v2423_v60, %v1702_v58 }
 0x190   :  { %v2443_v4 = vpop.f32.mrb[8].mxu0 }
 0x191   :  { %v2444_v5 = vpop.f32.mrb[9].mxu0 }
 0x192   :  { %v2445_v6 = vadd.f32 %v2444_v5, %v2443_v4  ;;  %v2446_v7 = vpop.f32.mrb[10].mxu0  ;;  %v2465_v8 = vpop.f32.mrb[8].mxu1 }
 0x193   :  { %v2447_v9 = vpop.f32.mrb[11].mxu0  ;;  %v2466_v10 = vpop.f32.mrb[9].mxu1 }
 0x194   :  { %v1782_v11 = vadd.f32 %v2445_v6, %v1742_v2  ;;  %v2467_v12 = vadd.f32 %v2466_v10, %v2465_v8  ;;  %v2468_v13 = vpop.f32.mrb[10].mxu1 }
 0x195   :  { %v2469_v14 = vpop.f32.mrb[11].mxu1 }
 0x196   :  { %v1822_v15 = vadd.f32 %v2467_v12, %v1782_v11 }
 0x1b0   :  { %v2487_v16 = vpop.f32.mrb[12].mxu0 }
 0x1b1   :  { %v2488_v17 = vpop.f32.mrb[13].mxu0 }
 0x1b2   :  { %v2489_v18 = vadd.f32 %v2488_v17, %v2487_v16  ;;  %v2490_v19 = vpop.f32.mrb[14].mxu0  ;;  %v2509_v20 = vpop.f32.mrb[12].mxu1 }
 0x1b3   :  { %v2491_v21 = vpop.f32.mrb[15].mxu0  ;;  %v2510_v22 = vpop.f32.mrb[13].mxu1 }
 0x1b4   :  { %v1862_v23 = vadd.f32 %v2489_v18, %v1822_v15  ;;  %v2511_v24 = vadd.f32 %v2510_v22, %v2509_v20  ;;  %v2512_v25 = vpop.f32.mrb[14].mxu1 }
 0x1b5   :  { %v2513_v26 = vpop.f32.mrb[15].mxu1 }
 0x1b6   :  { %v1902_v27 = vadd.f32 %v2511_v24, %v1862_v23 }
 0x1d0   :  { %v2531_v28 = vpop.f32.mrb[16].mxu0 }
 0x1d1   :  { %v2532_v29 = vpop.f32.mrb[17].mxu0 }
 0x1d2   :  { %v2533_v30 = vadd.f32 %v2532_v29, %v2531_v28  ;;  %v2534_v31 = vpop.f32.mrb[18].mxu0  ;;  %v2553_v32 = vpop.f32.mrb[16].mxu1 }
 0x1d3   :  { %v2535_v33 = vpop.f32.mrb[19].mxu0  ;;  %v2554_v35 = vpop.f32.mrb[17].mxu1 }
 0x1d4   :  { %v1942_v34 = vadd.f32 %v2533_v30, %v1902_v27  ;;  %v2555_v36 = vadd.f32 %v2554_v35, %v2553_v32  ;;  %v2556_v37 = vpop.f32.mrb[18].mxu1 }
 0x1d5   :  { %v2557_v38 = vpop.f32.mrb[19].mxu1 }
 0x1d6   :  { %v1982_v39 = vadd.f32 %v2555_v36, %v1942_v34 }
 0x1f0   :  { %v2575_v40 = vpop.f32.mrb[20].mxu0 }
 0x1f1   :  { %v2576_v41 = vpop.f32.mrb[21].mxu0 }
 0x1f2   :  { %v2577_v42 = vadd.f32 %v2576_v41, %v2575_v40  ;;  %v2578_v43 = vpop.f32.mrb[22].mxu0 }
 0x1f3   :  { %v2579_v44 = vpop.f32.mrb[23].mxu0 }
 0x1f4   :  { %v2022_v45 = vadd.f32 %v2577_v42, %v1982_v39 }
 0x1f6   :  { %v2027_v46 = vmax.f32 %v2022_v45, 0.0 }
 0x1f8   :  { %2631 = vmatmul.mubr.f32.vlgmr.msra.gmra.mrb[20].mxu1 %v2027_v46 }
 0x2cb   :  { %v2117_v48 = vpop.f32.mrb[20].mxu1 }
 0x2cc   :  { %v2118_v49 = vadd.f32 %v2338_v47, %v2117_v48  ;;  %v2632_v50 = vpop.f32.mrb[21].mxu1 }
 0x2ce   :  { %2121 = vst [vmem:[#allocation11] sm:$0xff] %v2118_v49 }
 0x2cf   :  { %2989 = shalt.err (!%p2986_p2)
}
 0x2d0   :  { %s2990_s7 = scalar_lea.hbm %s3128_s5, 128 }
 0x2d1   :  { %p2991_p3 = scmp.ne.s32.totalorder %s3128_s5, %s2990_s7  ;;  %p2994_p4 = scmp.lt.u32.totalorder %s2990_s7, %s3128_s5 }
 0x2d3   :  { %p2996_p5 = pnand %p2994_p4, %p2991_p3 }
 0x2d5   :  { %2999 = shalt.err (!%p2996_p5)
}
 0x2d6   :  { %2131 = dma.vmem_to_hbm [thread:$0]  %s2129_s29, 128, %s3128_s5, [#allocation4]  }
 0x2d7   :  { %3006 = dma.done.wait [#allocation4], 128  }
 0x2d8   :  { %3007 = vsyncadd [#allocation4], 4294967168 }
 0x2d9   :  { %2135 = vsyncpa [#allocation3], 1 }
 0x2da   :  { %2136 = vsyncpa [#allocation6], 1 }
 0x2db   :  { %2137 = vsyncpa [#allocation9], 1 }
 0x2dc   :  { %2138 = vsyncpa [#allocation4], 1 }

</bundles_post_ra>
